<compile_context>
chip_gen: v5e
topology: v5e:2x2
jax: 0.10.0
libtpu: 0.0.40
codegen_flags: <defaults>
</compile_context>

<pallas_src>
import jax
import jax.numpy as jnp
from jax.experimental import pallas as pl
from jax.experimental.pallas import tpu as pltpu


def pooler_kernel(x_ref, w1_ref, b1_ref, w2t_ref, b2_ref, o_ref):
    # x_ref:   (K, tb, H) VMEM  -- hidden states, H on lanes, batch rows on sublanes
    # w1_ref:  (K,)       SMEM  -- scalar-reweighting weights (f32 scalars)
    # b1_ref:  (1,)       SMEM  -- scalar-reweighting bias
    # w2t_ref: (H, H)     VMEM  -- dense weight, pre-transposed (y = pooled @ w2t + b2)
    # b2_ref:  (1, H)     VMEM  -- dense bias (f32)
    # o_ref:   (tb, H)    VMEM  -- output tile
    K = x_ref.shape[0]

    # Scalar reweighting: unrolled per-k accumulation in f32.  Each k-slice is a
    # fully lane/sublane-dense (tb, H) tile; no (tb,K,H) temporary materializes.
    pooled = x_ref[0].astype(jnp.float32) * w1_ref[0]
    for k in range(1, K):
        pooled = pooled + x_ref[k].astype(jnp.float32) * w1_ref[k]
    pooled = pooled + b1_ref[0]

    # Dense layer on the MXU: operands in the weight dtype (bf16 by default),
    # f32 accumulation.
    y = jnp.dot(pooled.astype(w2t_ref.dtype), w2t_ref[...],
                preferred_element_type=jnp.float32)
    y = y + b2_ref[...]
    o_ref[...] = jnp.tanh(y).astype(o_ref.dtype)


def prepare_params(w1, b1, w2, b2, *, matmul_dtype=jnp.bfloat16):
    """One-time parameter prep (hoisted out of the per-call path).

    w1: (1, 2L) = nn.Linear(2L, 1).weight -> (2L,) f32  (SMEM scalars)
    b1: (1,)    = nn.Linear(2L, 1).bias   -> (1,)  f32  (SMEM scalar)
    w2: (H, H)  = nn.Linear(H, H).weight  -> (H, H) pre-transposed, cast to matmul_dtype
    b2: (H,)    = nn.Linear(H, H).bias    -> (1, H) f32
    """
    K = w1.shape[-1]
    H = w2.shape[0]
    w2t = w2.T if matmul_dtype is None else w2.T.astype(matmul_dtype)
    return (w1.reshape(K).astype(jnp.float32),
            b1.reshape(1).astype(jnp.float32),
            w2t,
            b2.reshape(1, H).astype(jnp.float32))


def _vmem_budget_bytes():
    """Generation-aware VMEM budget (also used as vmem_limit_bytes)."""
    cap = 64 * 1024 * 1024                       # conservative fallback (v7x-sized)
    try:
        cap = int(pltpu.get_tpu_info().vmem_capacity_bytes)
    except Exception:
        pass
    # v7x (64 MiB) -> 48 MiB; v5e/v6e (128 MiB) -> 96 MiB.  Headroom for Mosaic
    # internal scratch / semaphores.
    return min(cap * 3 // 4, cap - (16 << 20))


def _choose_tb(B, K, H, x_itemsize, w_itemsize, budget):
    """Batch tile: largest that fits the VMEM budget (accurate footprint model)."""
    resident = H * H * w_itemsize + H * 4        # w2t + b2 (f32), single copy in VMEM
    if resident >= budget:
        # TODO(synk): tile the HxH dense matmul over an extra grid axis when w2 alone
        # exceeds the VMEM budget (H ~> 4k); not needed for this module's typical sizes.
        raise NotImplementedError("hidden_size too large for resident-weight tiling")
    if B <= 8:
        return B                                  # full-dim block (sublane rule needs == B here)
    per_row = (2 * K * H * x_itemsize             # double-buffered x tile
               + 2 * H * x_itemsize               # double-buffered out tile
               + 3 * H * 4)                       # in-kernel f32 temporaries (pooled / y / scratch)
    tb = (budget - resident) // per_row
    tb = min(tb, 1024)                            # ~512+ already saturates the HBM roofline
    tb = min(tb, 8 * ((B + 15) // 16))            # keep grid >= 2 (v7x megacore sharding)
    return max(8, (tb // 8) * 8)                  # sublane-aligned (not a coarse 256 round-down)


def protein_lstm_pooler(x_kbh, w1_k, b1, w2t, b2_1h, *, tb=None):
    """Pooler forward.  x_kbh: (2L, B, H) lane-dense producer layout, where
    x_kbh[k, b, h] == hidden_states[b, h, k] of the PyTorch module.
    Params come from prepare_params()."""
    K, B, H = x_kbh.shape
    budget = _vmem_budget_bytes()
    if tb is None:
        tb = _choose_tb(B, K, H, x_kbh.dtype.itemsize, w2t.dtype.itemsize, budget)

    grid_b = pl.cdiv(B, tb)   # no batch padding; a ragged tail block is masked by Pallas

    return pl.pallas_call(
        pooler_kernel,
        out_shape=jax.ShapeDtypeStruct((B, H), x_kbh.dtype),
        grid=(grid_b,),
        in_specs=[
            pl.BlockSpec((K, tb, H), lambda i: (0, i, 0)),           # x: pipelined over batch
            pl.BlockSpec(memory_space=pltpu.MemorySpace.SMEM),       # w1: SMEM scalars
            pl.BlockSpec(memory_space=pltpu.MemorySpace.SMEM),       # b1: SMEM scalar
            pl.BlockSpec(memory_space=pltpu.MemorySpace.VMEM),       # w2t: resident, single copy
            pl.BlockSpec(memory_space=pltpu.MemorySpace.VMEM),       # b2: resident, single copy
        ],
        out_specs=pl.BlockSpec((tb, H), lambda i: (i, 0)),
        compiler_params=pltpu.CompilerParams(
            dimension_semantics=("parallel",),    # megacore sharding on v7x (grid >= 2 when B > 8)
            vmem_limit_bytes=int(budget),         # aligned with the tb budget above
        ),
    )(x_kbh, w1_k, b1, w2t, b2_1h)


def protein_lstm_pooler_bhk(x_bhk, *params, tb=None):
    """Drop-in entry point for the PyTorch layout hidden_states: (B, H, 2L)."""
    # TODO(synk): have the upstream LSTM emit (2L, B, H) directly so this transpose
    # (an extra HBM round-trip over the dominant tensor) disappears from the hot path.
    return protein_lstm_pooler(jnp.transpose(x_bhk, (2, 0, 1)), *params, tb=tb)


def reference(x_kbh, w1, b1, w2, b2):
    """Pure-JAX reference in the PyTorch parameter convention.
    x_kbh[k, b, h] == hidden_states[b, h, k]."""
    pooled = jnp.einsum("kbh,k->bh", x_kbh, w1[0]) + b1[0]     # Linear(2L -> 1) + squeeze
    return jnp.tanh(pooled @ w2.T + b2)                        # tanh(Linear(H -> H))


if __name__ == "__main__":
    # Small config: num_hidden_layers = 4 -> 2L = 8, hidden_size = 32, batch = 2.
    B, H, L = 2, 32, 4
    K = 2 * L

    key = jax.random.PRNGKey(0)
    kx, k1, k2, k3, k4 = jax.random.split(key, 5)

    # hidden_states in the producer (lane-dense) layout (2L, B, H).
    x_kbh = jax.random.normal(kx, (K, B, H), dtype=jnp.float32)
    # scalar_reweighting = nn.Linear(2L, 1): weight (1, 2L), bias (1,)
    w1 = jax.random.normal(k1, (1, K), dtype=jnp.float32) * 0.1
    b1 = jax.random.normal(k2, (1,), dtype=jnp.float32) * 0.1
    # dense = nn.Linear(H, H): weight (H, H), bias (H,)
    w2 = jax.random.normal(k3, (H, H), dtype=jnp.float32) * 0.1
    b2 = jax.random.normal(k4, (H,), dtype=jnp.float32) * 0.1

    ref = reference(x_kbh, w1, b1, w2, b2)

    # f32 dense weights: exact parity with the PyTorch f32 Linear path.
    out_f32 = protein_lstm_pooler(x_kbh, *prepare_params(w1, b1, w2, b2, matmul_dtype=None))
    out_f32 = jax.block_until_ready(out_f32)
    assert out_f32.shape == (B, H)
    assert jnp.allclose(out_f32, ref, atol=1e-5, rtol=1e-5), "f32 path mismatch vs reference"

    # bf16 dense weights (default perf path): native MXU rate, f32 accumulation;
    # looser tolerance covers the bf16 weight quantization (tanh saturation keeps it small).
    out_bf16 = protein_lstm_pooler(x_kbh, *prepare_params(w1, b1, w2, b2))
    out_bf16 = jax.block_until_ready(out_bf16)
    assert out_bf16.shape == (B, H)
    assert jnp.allclose(out_bf16, ref, atol=2e-2, rtol=2e-2), "bf16 path mismatch vs reference"

    print("KERNEL_OK")
</pallas_src>

<mosaic_0001>
module attributes {stable_mosaic.version = 11 : i64} {
  func.func @pooler_kernel(%arg0: i32, %arg1: memref<8x2x32xf32, #tpu.memory_space<vmem>>, %arg2: memref<8xf32, #tpu.memory_space<smem>>, %arg3: memref<1xf32, #tpu.memory_space<smem>>, %arg4: memref<32x32xf32, #tpu.memory_space<vmem>>, %arg5: memref<1x32xf32, #tpu.memory_space<vmem>>, %arg6: memref<2x32xf32, #tpu.memory_space<vmem>>) attributes {dimension_semantics = [#tpu.dimension_semantics<parallel>], iteration_bounds = array<i64: 1>, scalar_prefetch = 0 : i64, scratch_operands = 0 : i64, tpu.core_type = #tpu.core_type<tc>, window_params = [{transform_indices = @transform_0, window_bounds = array<i64: 8, 2, 32>}, {transform_indices = @transform_1, window_bounds = array<i64: 8>}, {transform_indices = @transform_2, window_bounds = array<i64: 1>}, {pipeline_mode = #tpu.pipeline_mode<synchronous>, transform_indices = @transform_3, window_bounds = array<i64: 32, 32>}, {pipeline_mode = #tpu.pipeline_mode<synchronous>, transform_indices = @transform_4, window_bounds = array<i64: 1, 32>}, {transform_indices = @transform_5, window_bounds = array<i64: 2, 32>}]} {
    %c0 = arith.constant 0 : index
    %c0_0 = arith.constant 0 : index
    %c0_1 = arith.constant 0 : index
    %0 = vector.load %arg1[%c0, %c0_0, %c0_1] : memref<8x2x32xf32, #tpu.memory_space<vmem>>, vector<1x2x32xf32>
    %1 = vector.shape_cast %0 : vector<1x2x32xf32> to vector<2x32xf32>
    %c0_2 = arith.constant 0 : index
    %2 = memref.load %arg2[%c0_2] : memref<8xf32, #tpu.memory_space<smem>>
    %3 = vector.broadcast %2 : f32 to vector<2x32xf32>
    %4 = arith.mulf %1, %3 : vector<2x32xf32>
    %c1 = arith.constant 1 : index
    %c0_3 = arith.constant 0 : index
    %c0_4 = arith.constant 0 : index
    %5 = vector.load %arg1[%c1, %c0_3, %c0_4] : memref<8x2x32xf32, #tpu.memory_space<vmem>>, vector<1x2x32xf32>
    %6 = vector.shape_cast %5 : vector<1x2x32xf32> to vector<2x32xf32>
    %c1_5 = arith.constant 1 : index
    %7 = memref.load %arg2[%c1_5] : memref<8xf32, #tpu.memory_space<smem>>
    %8 = vector.broadcast %7 : f32 to vector<2x32xf32>
    %9 = arith.mulf %6, %8 : vector<2x32xf32>
    %10 = arith.addf %4, %9 : vector<2x32xf32>
    %c2 = arith.constant 2 : index
    %c0_6 = arith.constant 0 : index
    %c0_7 = arith.constant 0 : index
    %11 = vector.load %arg1[%c2, %c0_6, %c0_7] : memref<8x2x32xf32, #tpu.memory_space<vmem>>, vector<1x2x32xf32>
    %12 = vector.shape_cast %11 : vector<1x2x32xf32> to vector<2x32xf32>
    %c2_8 = arith.constant 2 : index
    %13 = memref.load %arg2[%c2_8] : memref<8xf32, #tpu.memory_space<smem>>
    %14 = vector.broadcast %13 : f32 to vector<2x32xf32>
    %15 = arith.mulf %12, %14 : vector<2x32xf32>
    %16 = arith.addf %10, %15 : vector<2x32xf32>
    %c3 = arith.constant 3 : index
    %c0_9 = arith.constant 0 : index
    %c0_10 = arith.constant 0 : index
    %17 = vector.load %arg1[%c3, %c0_9, %c0_10] : memref<8x2x32xf32, #tpu.memory_space<vmem>>, vector<1x2x32xf32>
    %18 = vector.shape_cast %17 : vector<1x2x32xf32> to vector<2x32xf32>
    %c3_11 = arith.constant 3 : index
    %19 = memref.load %arg2[%c3_11] : memref<8xf32, #tpu.memory_space<smem>>
    %20 = vector.broadcast %19 : f32 to vector<2x32xf32>
    %21 = arith.mulf %18, %20 : vector<2x32xf32>
    %22 = arith.addf %16, %21 : vector<2x32xf32>
    %c4 = arith.constant 4 : index
    %c0_12 = arith.constant 0 : index
    %c0_13 = arith.constant 0 : index
    %23 = vector.load %arg1[%c4, %c0_12, %c0_13] : memref<8x2x32xf32, #tpu.memory_space<vmem>>, vector<1x2x32xf32>
    %24 = vector.shape_cast %23 : vector<1x2x32xf32> to vector<2x32xf32>
    %c4_14 = arith.constant 4 : index
    %25 = memref.load %arg2[%c4_14] : memref<8xf32, #tpu.memory_space<smem>>
    %26 = vector.broadcast %25 : f32 to vector<2x32xf32>
    %27 = arith.mulf %24, %26 : vector<2x32xf32>
    %28 = arith.addf %22, %27 : vector<2x32xf32>
    %c5 = arith.constant 5 : index
    %c0_15 = arith.constant 0 : index
    %c0_16 = arith.constant 0 : index
    %29 = vector.load %arg1[%c5, %c0_15, %c0_16] : memref<8x2x32xf32, #tpu.memory_space<vmem>>, vector<1x2x32xf32>
    %30 = vector.shape_cast %29 : vector<1x2x32xf32> to vector<2x32xf32>
    %c5_17 = arith.constant 5 : index
    %31 = memref.load %arg2[%c5_17] : memref<8xf32, #tpu.memory_space<smem>>
    %32 = vector.broadcast %31 : f32 to vector<2x32xf32>
    %33 = arith.mulf %30, %32 : vector<2x32xf32>
    %34 = arith.addf %28, %33 : vector<2x32xf32>
    %c6 = arith.constant 6 : index
    %c0_18 = arith.constant 0 : index
    %c0_19 = arith.constant 0 : index
    %35 = vector.load %arg1[%c6, %c0_18, %c0_19] : memref<8x2x32xf32, #tpu.memory_space<vmem>>, vector<1x2x32xf32>
    %36 = vector.shape_cast %35 : vector<1x2x32xf32> to vector<2x32xf32>
    %c6_20 = arith.constant 6 : index
    %37 = memref.load %arg2[%c6_20] : memref<8xf32, #tpu.memory_space<smem>>
    %38 = vector.broadcast %37 : f32 to vector<2x32xf32>
    %39 = arith.mulf %36, %38 : vector<2x32xf32>
    %40 = arith.addf %34, %39 : vector<2x32xf32>
    %c7 = arith.constant 7 : index
    %c0_21 = arith.constant 0 : index
    %c0_22 = arith.constant 0 : index
    %41 = vector.load %arg1[%c7, %c0_21, %c0_22] : memref<8x2x32xf32, #tpu.memory_space<vmem>>, vector<1x2x32xf32>
    %42 = vector.shape_cast %41 : vector<1x2x32xf32> to vector<2x32xf32>
    %c7_23 = arith.constant 7 : index
    %43 = memref.load %arg2[%c7_23] : memref<8xf32, #tpu.memory_space<smem>>
    %44 = vector.broadcast %43 : f32 to vector<2x32xf32>
    %45 = arith.mulf %42, %44 : vector<2x32xf32>
    %46 = arith.addf %40, %45 : vector<2x32xf32>
    %c0_24 = arith.constant 0 : index
    %47 = memref.load %arg3[%c0_24] : memref<1xf32, #tpu.memory_space<smem>>
    %48 = vector.broadcast %47 : f32 to vector<2x32xf32>
    %49 = arith.addf %46, %48 : vector<2x32xf32>
    %c0_25 = arith.constant 0 : index
    %c0_26 = arith.constant 0 : index
    %50 = vector.load %arg4[%c0_25, %c0_26] : memref<32x32xf32, #tpu.memory_space<vmem>>, vector<32x32xf32>
    %cst = arith.constant dense<0.000000e+00> : vector<2x32xf32>
    %51 = tpu.matmul %49, %50, %cst {dimension_numbers = #tpu.dot_dimension_numbers<[1], [0], [0], [1], [0, 0, 1, 1], [], []>} : vector<2x32xf32>, vector<32x32xf32>, vector<2x32xf32> -> vector<2x32xf32>
    %c0_27 = arith.constant 0 : index
    %c0_28 = arith.constant 0 : index
    %52 = vector.load %arg5[%c0_27, %c0_28] : memref<1x32xf32, #tpu.memory_space<vmem>>, vector<1x32xf32>
    %53 = vector.broadcast %52 : vector<1x32xf32> to vector<2x32xf32>
    %54 = arith.addf %51, %53 : vector<2x32xf32>
    %55 = math.tanh %54 : vector<2x32xf32>
    %c0_29 = arith.constant 0 : index
    %c0_30 = arith.constant 0 : index
    %56 = vector.load %arg6[%c0_29, %c0_30] : memref<2x32xf32, #tpu.memory_space<vmem>>, vector<2x32xf32>
    tpu.vector_store %arg6[%c0_29, %c0_30], %55 {strides = array<i32>} : memref<2x32xf32, #tpu.memory_space<vmem>>, vector<2x32xf32>,
    return
  }
  func.func @transform_0(%arg0: i32) -> (i32, i32, i32) {
    %c0_i32 = arith.constant 0 : i32
    %c0_i32_0 = arith.constant 0 : i32
    %c0_i32_1 = arith.constant 0 : i32
    return %c0_i32, %arg0, %c0_i32_0 : i32, i32, i32
  }
  func.func @transform_1(%arg0: i32) -> i32 {
    %c0_i32 = arith.constant 0 : i32
    %c0_i32_0 = arith.constant 0 : i32
    return %c0_i32 : i32
  }
  func.func @transform_2(%arg0: i32) -> i32 {
    %c0_i32 = arith.constant 0 : i32
    %c0_i32_0 = arith.constant 0 : i32
    return %c0_i32 : i32
  }
  func.func @transform_3(%arg0: i32) -> (i32, i32) {
    %c0_i32 = arith.constant 0 : i32
    %c0_i32_0 = arith.constant 0 : i32
    %c0_i32_1 = arith.constant 0 : i32
    return %c0_i32, %c0_i32_0 : i32, i32
  }
  func.func @transform_4(%arg0: i32) -> (i32, i32) {
    %c0_i32 = arith.constant 0 : i32
    %c0_i32_0 = arith.constant 0 : i32
    %c0_i32_1 = arith.constant 0 : i32
    return %c0_i32, %c0_i32_0 : i32, i32
  }
  func.func @transform_5(%arg0: i32) -> (i32, i32) {
    %c0_i32 = arith.constant 0 : i32
    %c0_i32_0 = arith.constant 0 : i32
    return %arg0, %c0_i32 : i32, i32
  }
}

</mosaic_0001>

<bundles_post_ra>
// kernel: tpu_custom_call.1
= control target key start
LH: loop header
LB: loop body
LE: loop exit
PB: predicated region body
PF: predicated region fallthrough
CT: control target
= control target key end

     0   :  { %11 = vsyncpa [#allocation4], 0  ;;  %s337_s0 = inlined_call_operand.hbm [shape: f32[8,2,32], index: 0, kind: input, shape index: {}]   ;;  %s338_s1 = inlined_call_operand.vmem [shape: f32[8], index: 1, kind: input, shape index: {}]   ;;  %s339_s2 = inlined_call_operand.<no memory space> [shape: f32[1], index: 2, kind: input, shape index: {}]   ;;  %s340_s3 = inlined_call_operand.hbm [shape: f32[32,32], index: 3, kind: input, shape index: {}]   ;;  %s341_s4 = inlined_call_operand.vmem [shape: f32[1,32], index: 4, kind: input, shape index: {}]   ;;  %s342_s5 = inlined_call_operand.hbm [shape: f32[2,32], index: 5, kind: output, shape index: {}]  }
   0x1   :  { %12 = vsyncpa [#allocation6], 0 }
   0x2   :  { %13 = vsyncpa [#allocation9], 0 }
   0x3   :  { %14 = vsyncpa [#allocation5], 0  ;;  %s19_s20 = sshll.u32 %s337_s0, 4  ;;  %s281_s21 = smov [#allocation3]   ;;  %s20_s20 = int_to_ptr.hbm [resolvable:$true] %s19_s20 }
   0x4   :  { %s21_s22 = sshll.u32 %s281_s21, 4  ;;  %s33_s25 = sshll.u32 %s338_s1, 4  ;;  %s22_s22 = int_to_ptr.vmem [resolvable:$true] %s21_s22  ;;  %s34_s25 = int_to_ptr.vmem [resolvable:$true] %s33_s25 }
   0x5   :  { %s282_s26 = smov 32   ;;  %s283_s27 = smov 2  }
   0x6   :  { %27 = dma.hbm_to_vmem [thread:$0]  %s20_s20, 256, %s22_s22, [#allocation4], %s282_s26, %s282_s26, %s283_s27  }
   0x7   :  { %s284_s28 = smov [#allocation7]   ;;  %s43_s6 = sshll.u32 %s340_s3, 4  ;;  %s44_s6 = int_to_ptr.hbm [resolvable:$true] %s43_s6 }
   0x8   :  { %36 = dma.vmem_to_smem %s34_s25, 16, %s284_s28, [#allocation6]  }
   0x9   :  { %s285_s0 = smov [#allocation8]   ;;  %s286_s8 = smov 128  }
   0xa   :  { %s45_s7 = sshll.u32 %s285_s0, 4  ;;  %s287_s9 = smov 8   ;;  %s46_s7 = int_to_ptr.vmem [resolvable:$true] %s45_s7 }
   0xb   :  { %51 = dma.hbm_to_vmem [thread:$0]  %s44_s6, 512, %s46_s7, [#allocation9], %s286_s8, %s286_s8, %s287_s9  }
   0xc   :  { %273 = dma.done.wait [#allocation4], 256  }
   0xd   :  { %274 = vsyncadd [#allocation4], 4294967040 }
   0xe   :  { %275 = dma.done.wait [#allocation6], 16  }
   0xf   :  { %276 = vsyncadd [#allocation6], 4294967280 }
  0x10   :  { %277 = dma.done.wait [#allocation9], 512  }
  0x11   :  { %278 = vsyncadd [#allocation9], 4294966784 }
  0x12   :  { %66 = sfence }
  0x13   :  { %v119_v0 = vld [vmem:[#allocation8 + $0x18] sm:$0xff]  ;;  %v118_v1 = vld [vmem:[#allocation8 + $0x10] sm:$0xff]  ;;  %s68_s1 = sld [smem:[#allocation7]]  ;;  %v117_v2 = vld [vmem:[#allocation8 + $0x8] sm:$0xff]  ;;  %v114_v34 = vstv %s339_s2  ;;  %vm124_vm0 = vcmask 261120   ;;  %s288_s20 = smov [#allocation10]  }
  0x14   :  { %140 = vmatpush.msra.mxu0 %v119_v0  ;;  %s170_s3 = sld [smem:[#allocation7 + $0x1]]  ;;  %v116_v3 = vld [vmem:[#allocation8] sm:$0xff]  ;;  %v67_v4 = vld [vmem:[#allocation3] sm:$0x3]  ;;  %v72_v6 = vld [vmem:[#allocation3 + $0x2] sm:$0x3] }
  0x15   :  { %s171_s10 = sld [smem:[#allocation7 + $0x2]]  ;;  %v78_v8 = vld [vmem:[#allocation3 + $0x4] sm:$0x3]  ;;  %v84_v10 = vld [vmem:[#allocation3 + $0x6] sm:$0x3]  ;;  %s156_s21 = sshll.u32 %s288_s20, 4  ;;  %s157_s21 = int_to_ptr.vmem [resolvable:$true] %s156_s21 }
  0x16   :  { %141 = vmatpush.msra.mxu0 %v118_v1  ;;  %s172_s11 = sld [smem:[#allocation7 + $0x3]]  ;;  %v90_v15 = vld [vmem:[#allocation3 + $0x8] sm:$0x3]  ;;  %v96_v19 = vld [vmem:[#allocation3 + $0xa] sm:$0x3]  ;;  %s158_s24 = sshll.u32 %s342_s5, 4  ;;  %s159_s24 = int_to_ptr.hbm [resolvable:$true] %s158_s24 }
  0x17   :  { %s173_s12 = sld [smem:[#allocation7 + $0x4]]  ;;  %v102_v23 = vld [vmem:[#allocation3 + $0xc] sm:$0x3]  ;;  %v108_v27 = vld [vmem:[#allocation3 + $0xe] sm:$0x3]  ;;  %vm149_vm1 = vcmask 254976  }
  0x18   :  { %142 = vmatpush.msra.mxu0 %v117_v2  ;;  %s174_s13 = sld [smem:[#allocation7 + $0x5]]  ;;  %v186_v37 = vld [vmem:[%s341_s4] ss:$0 sm:$0xff] }
  0x19   :  { %v69_v5 = vstv %s68_s1  ;;  %s175_s14 = sld [smem:[#allocation7 + $0x6]] }
  0x1a   :  { %143 = vmatpush.msra.mxu0 %v116_v3  ;;  %v70_v7 = vmul.f32 %v69_v5, %v67_v4  ;;  %v74_v9 = vstv %s170_s3  ;;  %s176_s15 = sld [smem:[#allocation7 + $0x7]] }
  0x1b   :  { %v75_v11 = vmul.f32 %v74_v9, %v72_v6  ;;  %v80_v12 = vstv %s171_s10 }
  0x1c   :  { %v81_v13 = vmul.f32 %v80_v12, %v78_v8  ;;  %v86_v14 = vstv %s172_s11 }
  0x1d   :  { %v76_v16 = vadd.f32 %v75_v11, %v70_v7  ;;  %v87_v17 = vmul.f32 %v86_v14, %v84_v10  ;;  %v92_v18 = vstv %s173_s12 }
  0x1e   :  { %v98_v20 = vstv %s174_s13  ;;  %v93_v22 = vmul.f32 %v92_v18, %v90_v15 }
  0x1f   :  { %v82_v21 = vadd.f32 %v81_v13, %v76_v16  ;;  %v104_v24 = vstv %s175_s14  ;;  %v99_v26 = vmul.f32 %v98_v20, %v96_v19 }
  0x20   :  { %v110_v28 = vstv %s176_s15  ;;  %v105_v30 = vmul.f32 %v104_v24, %v102_v23 }
  0x21   :  { %v88_v25 = vadd.f32 %v87_v17, %v82_v21  ;;  %v111_v32 = vmul.f32 %v110_v28, %v108_v27 }
  0x23   :  { %v94_v29 = vadd.f32 %v93_v22, %v88_v25 }
  0x25   :  { %v100_v31 = vadd.f32 %v99_v26, %v94_v29 }
  0x27   :  { %v106_v33 = vadd.f32 %v105_v30, %v100_v31 }
  0x29   :  { %v112_v35 = vadd.f32 %v111_v32, %v106_v33 }
  0x2b   :  { %v115_v36 = vadd.f32 %v114_v34, %v112_v35 }
  0x2d   :  { %177 = vmatmul.msk.f32.vlgmr.msra.gmra.mxu0 %vm124_vm0, %v115_v36 }
  0xaa   :  { %v145_v38 = vpop.f32.mrf.mxu0 }
  0xab   :  { %v146_v39 = vadd.f32 %v186_v37, %v145_v38 }
  0xad   :  { %187 = vtanh.f32 %v146_v39 }
  0xb3   :  { %v188_v40 = vpop.eup %187 }
  0xb4   :  { %150 = vst.msk [vmem:[#allocation10] sm:$0x3] %vm149_vm1, %v188_v40 }
  0xb5   :  { %161 = dma.vmem_to_hbm [thread:$0]  %s157_s21, 32, %s159_s24, [#allocation5]  }
  0xb6   :  { %279 = dma.done.wait [#allocation5], 32  }
  0xb7   :  { %280 = vsyncadd [#allocation5], 4294967264 }
  0xb8   :  { %166 = vsyncpa [#allocation4], 1 }
  0xb9   :  { %167 = vsyncpa [#allocation9], 1 }
  0xba   :  { %168 = vsyncpa [#allocation5], 1 }
  0xbb   :  { %169 = vsyncpa [#allocation6], 1 }

</bundles_post_ra>
